<compile_context>
chip_gen: v5e
topology: v5e:2x2
jax: 0.10.0
libtpu: 0.0.40
codegen_flags: <defaults>
</compile_context>

<pallas_src>
import jax
import jax.numpy as jnp
from jax.experimental import pallas as pl
from jax.experimental.pallas import tpu as pltpu


# ----------------------------------------------------------------------------
# Path A: tiny vocabulary -> gather-as-matmul on the MXU (table in VMEM).
# ----------------------------------------------------------------------------
def _onehot_kernel(ids_ref, w_ref, p_ref, words_ref, pos_ref):
    # ids_ref:   (tile, 1) int32   token ids for this sequence tile (VMEM)
    #            (the (tile, 1) block is legal because 1 == full last dim)
    # w_ref:     (V, Dw)           full word-embedding table (VMEM resident)
    # p_ref:     (tile, Dp)        positional rows for this tile
    # words_ref: (tile, Dw)        word-embedding output block
    # pos_ref:   (tile, Dp)        positional-embedding output block
    tile = ids_ref.shape[0]
    vocab = w_ref.shape[0]

    ids = ids_ref[...]                                            # (tile, 1)
    iota = jax.lax.broadcasted_iota(jnp.int32, (tile, vocab), 1)  # (tile, V)
    one_hot = (iota == ids).astype(w_ref.dtype)                   # (tile, V)

    # Exact f32 gather via MXU matmul (kept f32 so it matches nn.Embedding).
    words = jnp.dot(one_hot, w_ref[...], preferred_element_type=jnp.float32)
    words_ref[...] = words.astype(words_ref.dtype)
    pos_ref[...] = p_ref[...]


# ----------------------------------------------------------------------------
# Path B: realistic vocabulary -> SMEM ids + per-row DMA gather from HBM table.
# ----------------------------------------------------------------------------
def _dma_gather_kernel(ids_smem, w_hbm, p_ref, words_ref, pos_ref, sem):
    # ids_smem:  (L,) int32 scalar-prefetched token ids (SMEM)
    # w_hbm:     (V, Dw) word-embedding table left in HBM (memory_space=ANY)
    # p_ref:     (tile, Dp) positional rows for this tile (VMEM)
    # words_ref: (tile, Dw) word output block (VMEM) -- DMA destination
    # pos_ref:   (tile, Dp) positional output block (VMEM)
    # sem:       DMA semaphore shared by all row copies of this tile
    tile = words_ref.shape[0]
    base = pl.program_id(0) * tile

    # Issue all row-gather DMAs for this tile.
    @pl.loop(0, tile)
    def _issue(r):
        tok = ids_smem[base + r]
        pltpu.make_async_copy(w_hbm.at[tok], words_ref.at[r], sem).start()

    # Overlap the (trivial) positional copy with the in-flight gathers.
    pos_ref[...] = p_ref[...]

    # Drain: one wait per issued copy (descriptor only needs matching size).
    @pl.loop(0, tile)
    def _drain(r):
        pltpu.make_async_copy(w_hbm.at[0], words_ref.at[r], sem).wait()


# ----------------------------------------------------------------------------
# Wrapper
# ----------------------------------------------------------------------------
def _pick_tile(L, requested):
    if requested is not None:
        assert L % requested == 0, "sequence length must be divisible by tile"
        return requested
    if L <= 512:
        return L                       # single / few grid steps, no pipelining
    for t in (512, 256, 128, 64, 32, 16, 8):
        if L % t == 0:
            return t
    return L                           # awkward lengths: one big step


def encoder_positional(ids, word_table, pos_table, *, tile=None,
                       vocab_matmul_max=1024):
    """ids: (L,) int; word_table: (V, Dw); pos_table: (P, Dp), P >= L."""
    L = ids.shape[0]
    V, Dw = word_table.shape
    P, Dp = pos_table.shape
    assert P >= L, "position table must cover the sequence length"

    ids = ids.astype(jnp.int32)
    pos_used = pos_table[:L]           # positions == arange(L): a pure slice
    tile = _pick_tile(L, tile)
    grid = (L // tile,)

    cparams = pltpu.CompilerParams(dimension_semantics=("parallel",))
    out_shape = (jax.ShapeDtypeStruct((L, Dw), word_table.dtype),
                 jax.ShapeDtypeStruct((L, Dp), pos_table.dtype))

    if V <= vocab_matmul_max:
        # Small table (<= ~4 MiB): keep it VMEM resident, gather via MXU.
        words, pos = pl.pallas_call(
            _onehot_kernel,
            out_shape=out_shape,
            grid_spec=pltpu.PrefetchScalarGridSpec(
                num_scalar_prefetch=0,
                grid=grid,
                in_specs=[
                    pl.BlockSpec((tile, 1), lambda i: (i, 0)),   # token ids
                    pl.BlockSpec((V, Dw), lambda i: (0, 0)),     # full table
                    pl.BlockSpec((tile, Dp), lambda i: (i, 0)),  # pos rows
                ],
                out_specs=[
                    pl.BlockSpec((tile, Dw), lambda i: (i, 0)),
                    pl.BlockSpec((tile, Dp), lambda i: (i, 0)),
                ],
            ),
            compiler_params=cparams,
        )(ids.reshape(L, 1), word_table, pos_used)
    else:
        # Large table: leave it in HBM, scalar-prefetch ids, DMA-gather rows.
        words, pos = pl.pallas_call(
            _dma_gather_kernel,
            out_shape=out_shape,
            grid_spec=pltpu.PrefetchScalarGridSpec(
                num_scalar_prefetch=1,                           # ids -> SMEM
                grid=grid,
                in_specs=[
                    pl.BlockSpec(memory_space=pl.ANY),           # table in HBM
                    pl.BlockSpec((tile, Dp), lambda i, ids_ref: (i, 0)),
                ],
                out_specs=[
                    pl.BlockSpec((tile, Dw), lambda i, ids_ref: (i, 0)),
                    pl.BlockSpec((tile, Dp), lambda i, ids_ref: (i, 0)),
                ],
                scratch_shapes=[pltpu.SemaphoreType.DMA(())],
            ),
            compiler_params=cparams,
        )(ids, word_table, pos_used)

    # Concatenate the two lane-dense halves in the XLA wrapper (keeps the
    # kernel stores unmasked instead of splitting one block at a non-128 lane).
    return jnp.concatenate([words, pos], axis=1)


if __name__ == "__main__":
    # Module hyper-parameters (small, consistent with the forward pass).
    vocab_size = 64
    position_size = 16
    word_emb_dim = 32
    positional_emb_dim = 16
    seq_len = 16  # len(input); must be <= position_size

    key = jax.random.PRNGKey(0)
    k_w, k_p, k_ids = jax.random.split(key, 3)

    # nn.Embedding default init: N(0, 1)
    word_table = jax.random.normal(k_w, (vocab_size, word_emb_dim), jnp.float32)
    pos_table = jax.random.normal(k_p, (position_size, positional_emb_dim),
                                  jnp.float32)
    ids = jax.random.randint(k_ids, (seq_len,), 0, vocab_size, jnp.int32)

    # Pure-JAX reference of the PyTorch forward.
    ref = jnp.concatenate(
        [word_table[ids], pos_table[jnp.arange(seq_len)]], axis=1)

    # Path A: tiny-vocab one-hot MXU gather (default at these sizes).
    out_mm = jax.block_until_ready(encoder_positional(ids, word_table, pos_table))
    assert out_mm.shape == (seq_len, word_emb_dim + positional_emb_dim)
    assert jnp.allclose(out_mm, ref, atol=1e-5), "matmul path mismatch vs reference"

    # Path B: HBM DMA-gather path, forced so it is validated at demo scale too.
    out_gather = jax.block_until_ready(
        encoder_positional(ids, word_table, pos_table, vocab_matmul_max=0))
    assert jnp.allclose(out_gather, ref, atol=1e-6), "gather path mismatch vs reference"

    print("KERNEL_OK")
</pallas_src>

<mosaic_0001>
module attributes {stable_mosaic.version = 11 : i64} {
  func.func @_onehot_kernel(%arg0: i32, %arg1: memref<16x1xi32, #tpu.memory_space<vmem>>, %arg2: memref<64x32xf32, #tpu.memory_space<vmem>>, %arg3: memref<16x16xf32, #tpu.memory_space<vmem>>, %arg4: memref<16x32xf32, #tpu.memory_space<vmem>>, %arg5: memref<16x16xf32, #tpu.memory_space<vmem>>) attributes {dimension_semantics = [#tpu.dimension_semantics<parallel>], iteration_bounds = array<i64: 1>, scalar_prefetch = 0 : i64, scratch_operands = 0 : i64, tpu.core_type = #tpu.core_type<tc>, window_params = [{transform_indices = @transform_0, window_bounds = array<i64: 16, 1>}, {pipeline_mode = #tpu.pipeline_mode<synchronous>, transform_indices = @transform_1, window_bounds = array<i64: 64, 32>}, {transform_indices = @transform_2, window_bounds = array<i64: 16, 16>}, {transform_indices = @transform_3, window_bounds = array<i64: 16, 32>}, {transform_indices = @transform_4, window_bounds = array<i64: 16, 16>}]} {
    %c0 = arith.constant 0 : index
    %c0_0 = arith.constant 0 : index
    %0 = vector.load %arg1[%c0, %c0_0] : memref<16x1xi32, #tpu.memory_space<vmem>>, vector<16x1xi32>
    %1 = tpu.iota {dimensions = array<i32: 1>} : vector<16x64xi32>
    %2 = vector.broadcast %0 : vector<16x1xi32> to vector<16x64xi32>
    %3 = arith.cmpi eq, %1, %2 : vector<16x64xi32>
    %4 = arith.extui %3 : vector<16x64xi1> to vector<16x64xi32>
    %5 = arith.sitofp %4 : vector<16x64xi32> to vector<16x64xf32>
    %c0_1 = arith.constant 0 : index
    %c0_2 = arith.constant 0 : index
    %6 = vector.load %arg2[%c0_1, %c0_2] : memref<64x32xf32, #tpu.memory_space<vmem>>, vector<64x32xf32>
    %cst = arith.constant dense<0.000000e+00> : vector<16x32xf32>
    %7 = tpu.matmul %5, %6, %cst {dimension_numbers = #tpu.dot_dimension_numbers<[1], [0], [0], [1], [0, 0, 1, 1], [], []>} : vector<16x64xf32>, vector<64x32xf32>, vector<16x32xf32> -> vector<16x32xf32>
    %c0_3 = arith.constant 0 : index
    %c0_4 = arith.constant 0 : index
    %8 = vector.load %arg4[%c0_3, %c0_4] : memref<16x32xf32, #tpu.memory_space<vmem>>, vector<16x32xf32>
    tpu.vector_store %arg4[%c0_3, %c0_4], %7 {strides = array<i32>} : memref<16x32xf32, #tpu.memory_space<vmem>>, vector<16x32xf32>,
    %c0_5 = arith.constant 0 : index
    %c0_6 = arith.constant 0 : index
    %9 = vector.load %arg3[%c0_5, %c0_6] : memref<16x16xf32, #tpu.memory_space<vmem>>, vector<16x16xf32>
    %c0_7 = arith.constant 0 : index
    %c0_8 = arith.constant 0 : index
    %10 = vector.load %arg5[%c0_7, %c0_8] : memref<16x16xf32, #tpu.memory_space<vmem>>, vector<16x16xf32>
    tpu.vector_store %arg5[%c0_7, %c0_8], %9 {strides = array<i32>} : memref<16x16xf32, #tpu.memory_space<vmem>>, vector<16x16xf32>,
    return
  }
  func.func @transform_0(%arg0: i32) -> (i32, i32) {
    %c0_i32 = arith.constant 0 : i32
    %c0_i32_0 = arith.constant 0 : i32
    return %arg0, %c0_i32 : i32, i32
  }
  func.func @transform_1(%arg0: i32) -> (i32, i32) {
    %c0_i32 = arith.constant 0 : i32
    %c0_i32_0 = arith.constant 0 : i32
    %c0_i32_1 = arith.constant 0 : i32
    return %c0_i32, %c0_i32_0 : i32, i32
  }
  func.func @transform_2(%arg0: i32) -> (i32, i32) {
    %c0_i32 = arith.constant 0 : i32
    %c0_i32_0 = arith.constant 0 : i32
    return %arg0, %c0_i32 : i32, i32
  }
  func.func @transform_3(%arg0: i32) -> (i32, i32) {
    %c0_i32 = arith.constant 0 : i32
    %c0_i32_0 = arith.constant 0 : i32
    return %arg0, %c0_i32 : i32, i32
  }
  func.func @transform_4(%arg0: i32) -> (i32, i32) {
    %c0_i32 = arith.constant 0 : i32
    %c0_i32_0 = arith.constant 0 : i32
    return %arg0, %c0_i32 : i32, i32
  }
}

</mosaic_0001>

<bundles_post_ra>
// kernel: tpu_custom_call.1
= control target key start
LH: loop header
LB: loop body
LE: loop exit
PB: predicated region body
PF: predicated region fallthrough
CT: control target
= control target key end

     0   :  { %10 = vsyncpa [#allocation3], 0  ;;  %v187_v2 = vmov 0   ;;  %s260_s0 = inlined_call_operand.vmem [shape: s32[16,1], index: 0, kind: input, shape index: {}]   ;;  %s261_s1 = inlined_call_operand.vmem [shape: f32[64,32], index: 1, kind: input, shape index: {}]   ;;  %s262_s2 = inlined_call_operand.vmem [shape: f32[16,16], index: 2, kind: input, shape index: {}]   ;;  %s263_s3 = inlined_call_operand.hbm [shape: f32[16,32], index: 3, kind: output, shape index: {0}]   ;;  %s264_s4 = inlined_call_operand.hbm [shape: f32[16,16], index: 4, kind: output, shape index: {1}]  }
   0x1   :  { %v18_v0 = vld [vmem:[%s260_s0] sm:$0xff]  ;;  %v41_v1 = vld [vmem:[%s261_s1 + $0x38] sm:$0xff]  ;;  %134 = vset.pattern.permute.xlu0 %v187_v2  ;;  %v40_v3 = vld [vmem:[%s261_s1 + $0x30] sm:$0xff] }
   0x2   :  { %57 = vmatpush.msra.mxu0 %v41_v1  ;;  %23 = vperm.xlu0 %134, %v18_v0   ;;  %v39_v4 = vld [vmem:[%s261_s1 + $0x28] sm:$0xff] }
   0x3   :  { %120 = vmatpush.msra.mxu1 %v41_v1 }
   0x4   :  { %58 = vmatpush.msra.mxu0 %v40_v3 }
   0x5   :  { %11 = vsyncpa [#allocation5], 0  ;;  %v38_v5 = vld [vmem:[%s261_s1 + $0x20] sm:$0xff]  ;;  %121 = vmatpush.msra.mxu1 %v40_v3  ;;  %v37_v6 = vld [vmem:[%s261_s1 + $0x18] sm:$0xff]  ;;  %v20_v11 = vlaneseq  ;;  %vm42_vm0 = vcmask 523264   ;;  %v188_v14 = vmov 0.0  }
   0x6   :  { %59 = vmatpush.msra.mxu0 %v39_v4  ;;  %v19_v7 = vld [vmem:[%s260_s0 + $0x8] sm:$0xff]  ;;  %v36_v8 = vld [vmem:[%s261_s1 + $0x10] sm:$0xff]  ;;  %v34_v10 = vld [vmem:[%s261_s1] sm:$0xff]  ;;  %s189_s0 = smov [#allocation4]   ;;  %vm77_vm3 = vcmask 130048   ;;  %s190_s16 = smov 128  }
   0x7   :  { %122 = vmatpush.msra.mxu1 %v39_v4  ;;  %v35_v9 = vld [vmem:[%s261_s1 + $0x8] sm:$0xff]  ;;  %v21_v12 = vand.u32 127, %v20_v11  ;;  %s97_s9 = sshll.u32 %s189_s0, 4  ;;  %s99_s1 = sshll.u32 %s264_s4, 4  ;;  %v75_v18 = vld [vmem:[%s262_s2] sm:$0xff]  ;;  %vm72_vm4 = vcmask 261120   ;;  %s98_s9 = int_to_ptr.vmem [resolvable:$true] %s97_s9  ;;  %s100_s1 = int_to_ptr.hbm [resolvable:$true] %s99_s1 }
   0x8   :  { %60 = vmatpush.msra.mxu0 %v38_v5  ;;  %v76_v19 = vld [vmem:[%s262_s2 + $0x8] sm:$0xff]  ;;  %78 = vst.msk [vmem:[#allocation4] sm:$0xff] %vm77_vm3, %v75_v18  ;;  %s191_s17 = smov 8   ;;  %s192_s4 = smov [#allocation2]  }
   0x9   :  { %123 = vmatpush.msra.mxu1 %v38_v5  ;;  %79 = vst.msk [vmem:[#allocation4 + $0x8] sm:$0xff] %vm77_vm3, %v76_v19  ;;  %s84_s18 = sshll.u32 %s192_s4, 4  ;;  %s86_s21 = sshll.u32 %s263_s3, 4  ;;  %s85_s18 = int_to_ptr.vmem [resolvable:$true] %s84_s18  ;;  %s87_s21 = int_to_ptr.hbm [resolvable:$true] %s86_s21 }
   0xa   :  { %61 = vmatpush.msra.mxu0 %v37_v6  ;;  %26 = vperm.xlu0 %134, %v19_v7   ;;  %105 = dma.vmem_to_hbm [thread:$0]  %s98_s9, 256, %s100_s1, [#allocation5], %s190_s16, %s190_s16, %s191_s17  }
   0xb   :  { %124 = vmatpush.msra.mxu1 %v37_v6 }
   0xc   :  { %62 = vmatpush.msra.mxu0 %v36_v8 }
   0xd   :  { %125 = vmatpush.msra.mxu1 %v36_v8 }
   0xe   :  { %63 = vmatpush.msra.mxu0 %v35_v9 }
   0xf   :  { %126 = vmatpush.msra.mxu1 %v35_v9 }
  0x10   :  { %64 = vmatpush.msra.mxu0 %v34_v10 }
  0x11   :  { %127 = vmatpush.msra.mxu1 %v34_v10 }
  0x74   :  { %v24_v13 = vpop.permute.xlu0 %23 }
  0x75   :  { %vm28_vm1 = vcmp.eq.s32.totalorder %v21_v12, %v24_v13 }
  0x76   :  { %v116_v15 = vsel %vm28_vm1, 1.0, %v188_v14 }
  0x77   :  { %118 = vmatmul.msk.f32.vlgmr.msra.gmra.mxu0 %vm42_vm0, %v116_v15 }
  0x7c   :  { %v27_v16 = vpop.permute.xlu0 %26 }
  0x7d   :  { %vm29_vm2 = vcmp.eq.s32.totalorder %v21_v12, %v27_v16 }
  0x7e   :  { %v117_v17 = vsel %vm29_vm2, 1.0, %v188_v14 }
  0x7f   :  { %119 = vmatmul.msk.f32.vlgmr.msra.gmra.mxu1 %vm42_vm0, %v117_v17 }
  0xf4   :  { %v66_v20 = vpop.f32.mrf.mxu0 }
  0xf5   :  { %73 = vst.msk [vmem:[#allocation2] sm:$0xff] %vm72_vm4, %v66_v20 }
  0xfc   :  { %v69_v21 = vpop.f32.mrf.mxu1 }
  0xfd   :  { %74 = vst.msk [vmem:[#allocation2 + $0x8] sm:$0xff] %vm72_vm4, %v69_v21 }
  0xfe   :  { %92 = dma.vmem_to_hbm [thread:$0]  %s85_s18, 256, %s87_s21, [#allocation3], %s190_s16, %s190_s16, %s191_s17  }
  0xff   :  { %183 = dma.done.wait [#allocation3], 256  }
 0x100   :  { %184 = vsyncadd [#allocation3], 4294967040 }
 0x101   :  { %185 = dma.done.wait [#allocation5], 256  }
 0x102   :  { %186 = vsyncadd [#allocation5], 4294967040 }
 0x103   :  { %114 = vsyncpa [#allocation3], 1 }
 0x104   :  { %115 = vsyncpa [#allocation5], 1 }

</bundles_post_ra>
